<compile_context>
chip_gen: v7x
topology: tpu7x:2x2x1
jax: 0.10.0
libtpu: 0.0.40
codegen_flags: <defaults>
</compile_context>

<pallas_src>
import math

import jax
import jax.numpy as jnp
from jax.experimental import pallas as pl
from jax.experimental.pallas import tpu as pltpu


def _round_up(x, m):
    return ((x + m - 1) // m) * m


def _pick_tile(n, sub, cap):
    """Largest multiple of `sub` <= cap that divides n (avoids token padding
    and the extra output-slice HBM pass); otherwise round n up to `sub`,
    capped at `cap`."""
    cap = max(sub, (cap // sub) * sub)
    t = cap
    while t >= sub:
        if n % t == 0:
            return t
        t -= sub
    return min(cap, _round_up(n, sub))


def _vmem_budgets():
    """(vmem_limit_bytes, resident_gate_bytes), generation aware.

    v5e/v6e have 128 MiB physical VMEM; v7x only 64 MiB, so both the scoped
    limit and the 'table may live in VMEM' gate must differ per generation."""
    phys = 64 << 20
    try:
        info = pltpu.get_tpu_info()
        phys = int(getattr(info, "vmem_capacity_bytes", phys))
    except Exception:
        pass
    if phys >= (128 << 20):        # v5e / v6e
        return (96 << 20, 80 << 20)
    return (48 << 20, 32 << 20)    # v7x (or unknown -> conservative)


# ----------------------------------------------------------------------------
# Path 1: VMEM-resident table, one-hot MXU gather, TOK tokens per grid step.
# ----------------------------------------------------------------------------
def _onehot_kernel_factory(scale, vocab):
    def kernel(ids_ref, lut_ref, out_ref):
        # ids_ref: (TOK, 1) int32 token ids for this tile (VMEM)
        # lut_ref: (vocab, d) full embedding table (VMEM-resident)
        # out_ref: (TOK, d) output tile
        ids = ids_ref[...]                                            # (TOK, 1)
        cols = jax.lax.broadcasted_iota(jnp.int32, (1, vocab), 1)     # (1, vocab)
        one_hot = (ids == cols).astype(lut_ref.dtype)                 # (TOK, vocab)
        emb = jnp.dot(one_hot, lut_ref[...],
                      preferred_element_type=jnp.float32)             # (TOK, d) f32
        # Post-matmul f32 scale keeps bf16 tables numerically consistent with
        # the gather path (and avoids rounding sqrt(n_units) to bf16).
        out_ref[...] = (emb * scale).astype(out_ref.dtype)

    return kernel


def _word_embedding_resident(ids_col, lut, scale, tok, vmem_limit_bytes):
    tok_pad = ids_col.shape[0]
    vocab, d = lut.shape
    return pl.pallas_call(
        _onehot_kernel_factory(scale, vocab),
        grid_spec=pltpu.PrefetchScalarGridSpec(
            num_scalar_prefetch=0,
            grid=(tok_pad // tok,),
            in_specs=[
                # Per-tile token ids.
                pl.BlockSpec((tok, 1), lambda i: (i, 0)),
                # Full table, constant index_map + single buffering:
                # DMA'd from HBM exactly once and kept resident (no 2x VMEM).
                pl.BlockSpec((vocab, d), lambda i: (0, 0),
                             pipeline_mode=pl.Buffered(1)),
            ],
            out_specs=pl.BlockSpec((tok, d), lambda i: (i, 0)),
        ),
        out_shape=jax.ShapeDtypeStruct((tok_pad, d), lut.dtype),
        compiler_params=pltpu.CompilerParams(
            # Token tiles are independent; lets v7x shard them across its 2 TCs.
            # TODO(synk): use pltpu.CORE_PARALLEL / core_map for a guaranteed
            # 2-TC split on v7x when the grid has many steps.
            dimension_semantics=("parallel",),
            vmem_limit_bytes=vmem_limit_bytes,
        ),
    )(ids_col, lut)


# ----------------------------------------------------------------------------
# Path 2 (large vocab): HBM table + per-row DMA gather, TOK rows per grid step,
# manual (2, TOK, d) VMEM double buffer with next-tile prefetch.
# ----------------------------------------------------------------------------
def _gather_kernel_factory(scale, tok, vocab):
    def kernel(ids_ref, lut_hbm, out_ref, buf, sem):
        # ids_ref : SMEM (tok_pad,) int32 (scalar prefetch)
        # lut_hbm : (vocab, d) embedding table, left in HBM (memory_space=ANY)
        # out_ref : (tok, d) output tile (VMEM)
        # buf     : (2, tok, d) VMEM double buffer
        # sem     : (2,) DMA semaphores, one per slot
        i = pl.program_id(0)
        n = pl.num_programs(0)

        def issue_tile(tile_idx, slot):
            base = tile_idx * tok

            def issue_row(r, carry):
                tid = ids_ref[base + r]
                # Clamp: an out-of-range id would otherwise launch an OOB DMA
                # (no runtime bounds check on TPU).  PyTorch raises here.
                tid = jnp.minimum(jnp.maximum(tid, 0), vocab - 1)
                pltpu.make_async_copy(
                    lut_hbm.at[pl.ds(tid, 1), :],
                    buf.at[slot, pl.ds(r, 1), :],
                    sem.at[slot],
                ).start()
                return carry

            jax.lax.fori_loop(0, tok, issue_row, 0)

        # Prime slot 0 on the first step.
        @pl.when(i == 0)
        def _():
            issue_tile(0, 0)

        slot = i % 2

        # Prefetch the next tile's rows into the other slot while this tile's
        # DMAs drain / compute runs.
        @pl.when(i + 1 < n)
        def _():
            issue_tile(i + 1, 1 - slot)

        # All TOK row copies for this tile signalled sem[slot] with d*itemsize
        # bytes each; one aggregate wait for the full (tok, d) byte count.
        pltpu.make_async_copy(
            lut_hbm.at[pl.ds(0, tok), :], buf.at[slot], sem.at[slot]).wait()

        rows = buf[slot]
        out_ref[...] = (rows.astype(jnp.float32) * scale).astype(out_ref.dtype)

    return kernel


def _word_embedding_gather(ids_padded, lut, scale, tok):
    tok_pad = ids_padded.shape[0]
    vocab, d = lut.shape
    return pl.pallas_call(
        _gather_kernel_factory(scale, tok, vocab),
        grid_spec=pltpu.PrefetchScalarGridSpec(
            num_scalar_prefetch=1,
            grid=(tok_pad // tok,),
            in_specs=[pl.BlockSpec(memory_space=pl.ANY)],  # table stays in HBM
            out_specs=pl.BlockSpec((tok, d), lambda i, ids: (i, 0)),
            scratch_shapes=[
                pltpu.VMEM((2, tok, d), lut.dtype),
                pltpu.SemaphoreType.DMA((2,)),
            ],
        ),
        out_shape=jax.ShapeDtypeStruct((tok_pad, d), lut.dtype),
        compiler_params=pltpu.CompilerParams(
            dimension_semantics=("arbitrary",),  # cross-step prefetch carry
        ),
    )(ids_padded, lut)


# ----------------------------------------------------------------------------
# Public wrapper.
# ----------------------------------------------------------------------------
def word_embedding(x_ids, lut, *, max_resident_vocab=8192, _force_path=None):
    """x_ids: int [...]; lut: [vocab, n_units].

    Returns lut[x_ids] * sqrt(n_units) with shape x_ids.shape + (n_units,).
    """
    vocab, n_units = lut.shape
    lead_shape = tuple(x_ids.shape)
    num_tokens = 1
    for s in lead_shape:
        num_tokens *= int(s)
    scale = float(math.sqrt(n_units))  # plain Python float -> no captured const
    dtype = lut.dtype
    itemsize = jnp.dtype(dtype).itemsize

    # bf16 (and narrower) pack 16+ rows per vreg sublane group.
    sub = 16 if itemsize < 4 else 8
    vmem_limit_bytes, resident_gate = _vmem_budgets()

    ids_flat = x_ids.reshape(num_tokens).astype(jnp.int32)

    # Token tile: prefer a divisor of num_tokens (no id padding, no output
    # slice HBM pass), capped at 256 to match the v6e/v7x MXU tile width.
    tok = _pick_tile(num_tokens, sub, cap=256)

    # VMEM estimate for the resident path: single-buffered table,
    # double-buffered ids/out, one-hot + f32 matmul temporaries.
    est_bytes = (vocab * n_units * itemsize
                 + 2 * tok * n_units * itemsize
                 + 2 * tok * 4
                 + tok * vocab * (4 + itemsize)
                 + tok * n_units * 4)
    # TODO(synk): lower max_resident_vocab (~2048) on v5e, where the one-hot
    # matmul becomes MXU-bound at much smaller vocab than on v6e/v7x.
    use_resident = (est_bytes <= resident_gate) and (vocab <= max_resident_vocab)
    if _force_path == "resident":
        use_resident = True
    elif _force_path == "gather":
        use_resident = False

    if not use_resident and tok > vocab:
        # The gather kernel's aggregate-wait descriptor slices `tok` table rows.
        tok = _pick_tile(num_tokens, sub, cap=max(sub, (vocab // sub) * sub))

    tok_pad = _round_up(num_tokens, tok)
    ids_padded = (ids_flat if tok_pad == num_tokens
                  else jnp.pad(ids_flat, (0, tok_pad - num_tokens)))

    if use_resident:
        out = _word_embedding_resident(ids_padded.reshape(tok_pad, 1), lut,
                                       scale, tok, vmem_limit_bytes)
    else:
        out = _word_embedding_gather(ids_padded, lut, scale, tok)

    if tok_pad != num_tokens:
        out = out[:num_tokens]
    return out.reshape(*lead_shape, n_units)


if __name__ == "__main__":
    # Small, deterministic shapes consistent with the module.
    batch, seq = 2, 8
    vocab, n_units = 64, 128

    key = jax.random.PRNGKey(0)
    k_lut, k_ids, k_lut2, k_ids2 = jax.random.split(key, 4)

    # nn.Embedding default init ~ N(0, 1); synthetic deterministic weights.
    lut = jax.random.normal(k_lut, (vocab, n_units), dtype=jnp.float32)
    x_ids = jax.random.randint(k_ids, (batch, seq), 0, vocab, dtype=jnp.int32)

    out = jax.block_until_ready(word_embedding(x_ids, lut))
    ref = lut[x_ids] * jnp.float32(math.sqrt(n_units))
    assert out.shape == (batch, seq, n_units)
    assert jnp.allclose(out, ref, atol=1e-5, rtol=1e-5)

    # Exercise the large-vocab batched-gather fallback path as well.
    vocab2 = 512
    lut2 = jax.random.normal(k_lut2, (vocab2, n_units), dtype=jnp.float32)
    x_ids2 = jax.random.randint(k_ids2, (batch, seq), 0, vocab2, dtype=jnp.int32)
    out2 = jax.block_until_ready(
        word_embedding(x_ids2, lut2, _force_path="gather"))
    ref2 = lut2[x_ids2] * jnp.float32(math.sqrt(n_units))
    assert out2.shape == (batch, seq, n_units)
    assert jnp.allclose(out2, ref2, atol=1e-5, rtol=1e-5)

    print("KERNEL_OK")
</pallas_src>

<mosaic_0001>
module attributes {stable_mosaic.version = 11 : i64} {
  func.func @kernel(%arg0: i32, %arg1: memref<16x1xi32, #tpu.memory_space<vmem>>, %arg2: memref<64x128xf32, #tpu.memory_space<vmem>>, %arg3: memref<16x128xf32, #tpu.memory_space<vmem>>) attributes {dimension_semantics = [#tpu.dimension_semantics<parallel>], iteration_bounds = array<i64: 1>, scalar_prefetch = 0 : i64, scratch_operands = 0 : i64, tpu.core_type = #tpu.core_type<tc>, window_params = [{transform_indices = @transform_0, window_bounds = array<i64: 16, 1>}, {pipeline_mode = #tpu.pipeline_mode<synchronous>, transform_indices = @transform_1, window_bounds = array<i64: 64, 128>}, {transform_indices = @transform_2, window_bounds = array<i64: 16, 128>}]} {
    %c0 = arith.constant 0 : index
    %c0_0 = arith.constant 0 : index
    %0 = vector.load %arg1[%c0, %c0_0] : memref<16x1xi32, #tpu.memory_space<vmem>>, vector<16x1xi32>
    %1 = tpu.iota {dimensions = array<i32: 1>} : vector<1x64xi32>
    %2 = vector.broadcast %0 : vector<16x1xi32> to vector<16x64xi32>
    %3 = vector.broadcast %1 : vector<1x64xi32> to vector<16x64xi32>
    %4 = arith.cmpi eq, %2, %3 : vector<16x64xi32>
    %5 = arith.extui %4 : vector<16x64xi1> to vector<16x64xi32>
    %6 = arith.sitofp %5 : vector<16x64xi32> to vector<16x64xf32>
    %c0_1 = arith.constant 0 : index
    %c0_2 = arith.constant 0 : index
    %7 = vector.load %arg2[%c0_1, %c0_2] : memref<64x128xf32, #tpu.memory_space<vmem>>, vector<64x128xf32>
    %cst = arith.constant dense<0.000000e+00> : vector<16x128xf32>
    %8 = tpu.matmul %6, %7, %cst {dimension_numbers = #tpu.dot_dimension_numbers<[1], [0], [0], [1], [0, 0, 1, 1], [], []>} : vector<16x64xf32>, vector<64x128xf32>, vector<16x128xf32> -> vector<16x128xf32>
    %cst_3 = arith.constant 11.3137083 : f32
    %9 = vector.broadcast %cst_3 : f32 to vector<16x128xf32>
    %10 = arith.mulf %8, %9 : vector<16x128xf32>
    %c0_4 = arith.constant 0 : index
    %c0_5 = arith.constant 0 : index
    %11 = vector.load %arg3[%c0_4, %c0_5] : memref<16x128xf32, #tpu.memory_space<vmem>>, vector<16x128xf32>
    tpu.vector_store %arg3[%c0_4, %c0_5], %10 {strides = array<i32>} : memref<16x128xf32, #tpu.memory_space<vmem>>, vector<16x128xf32>,
    return
  }
  func.func @transform_0(%arg0: i32) -> (i32, i32) {
    %c0_i32 = arith.constant 0 : i32
    %c0_i32_0 = arith.constant 0 : i32
    return %arg0, %c0_i32 : i32, i32
  }
  func.func @transform_1(%arg0: i32) -> (i32, i32) {
    %c0_i32 = arith.constant 0 : i32
    %c0_i32_0 = arith.constant 0 : i32
    %c0_i32_1 = arith.constant 0 : i32
    return %c0_i32, %c0_i32_0 : i32, i32
  }
  func.func @transform_2(%arg0: i32) -> (i32, i32) {
    %c0_i32 = arith.constant 0 : i32
    %c0_i32_0 = arith.constant 0 : i32
    return %arg0, %c0_i32 : i32, i32
  }
}

</mosaic_0001>

<bundles_post_ra>
// kernel: tpu_custom_call.1
= control target key start
LH: loop header
LB: loop body
LE: loop exit
PB: predicated region body
PF: predicated region fallthrough
CT: control target
= control target key end

     0   :  { %7 = vsyncpa [#allocation3], 0  ;;  %s314_s0 = inlined_call_operand.vmem [shape: s32[16,1], index: 0, kind: input, shape index: {}]   ;;  %s315_s1 = inlined_call_operand.hbm [shape: f32[64,128], index: 1, kind: input, shape index: {}]   ;;  %s316_s2 = inlined_call_operand.hbm [shape: f32[16,128], index: 2, kind: output, shape index: {}]  }
   0x1   :  { %8 = vsyncpa [#allocation4], 0  ;;  %s257_s9 = smov [#allocation2]   ;;  %s209_s13 = scalar_lea.hbm %s315_s1, 1024 }
   0x2   :  { %s16_s10 = sshll.u32 %s257_s9, 4  ;;  %p210_p0 = scmp.ne.s32.totalorder %s315_s1, %s209_s13  ;;  %s17_s10 = int_to_ptr.vmem [resolvable:$true] %s16_s10 }
   0x3   :  { %p213_p1 = scmp.lt.u32.totalorder %s209_s13, %s315_s1 }
   0x5   :  { %p215_p2 = pnand %p213_p1, %p210_p0 }
   0x7   :  { %218 = shalt.err (!%p215_p2)
}
   0x8   :  { %s219_s18 = scalar_lea.vmem %s17_s10, 1024  ;;  %p224_p4 = scmp.lt.s32.totalorder %s17_s10, %s17_s10 }
   0x9   :  { %p220_p3 = scmp.ne.s32.totalorder %s17_s10, %s219_s18  ;;  %p225_p5 = scmp.lt.s32.totalorder %s219_s18, %s219_s18 }
   0xb   :  { %p226_p6 = por %p225_p5, %p224_p4 }
   0xd   :  { %p227_p7 = pnand %p226_p6, %p220_p3 }
   0xf   :  { %230 = shalt.err (!%p227_p7)
}
  0x10   :  { %s258_s19 = smov 128   ;;  %s259_s20 = smov 8  }
  0x11   :  { %22 = dma.hbm_to_vmem [thread:$0]  %s315_s1, 1024, %s17_s10, [#allocation3], %s258_s19, %s258_s19, %s259_s20  }
  0x12   :  { %253 = dma.done.wait [#allocation3], 1024  }
  0x13   :  { %254 = vsyncadd [#allocation3], 4294966272  ;;  %v260_v0 = vmov 0   ;;  %v26_v1 = vld [vmem:[%s314_s0] sm:$0xff]  ;;  %v43_v3 = vld [vmem:[#allocation2 + $0x8] sm:$0xff]  ;;  %v28_v15 = vlaneseq  ;;  %vm50_vm0 = vcmask 523264  }
  0x14   :  { %208 = vset.pattern.permute.xlu0 %v260_v0  ;;  %v42_v2 = vld [vmem:[#allocation2] sm:$0xff]  ;;  %v44_v4 = vld [vmem:[#allocation2 + $0x10] sm:$0xff]  ;;  %v45_v5 = vld [vmem:[#allocation2 + $0x18] sm:$0xff]  ;;  %v261_v18 = vmov 0.0  }
  0x15   :  { %31 = vperm.xlu0 %208, %v26_v1   ;;  %v27_v6 = vld [vmem:[%s314_s0 + $0x8] sm:$0xff]  ;;  %v186_v7 = vpack.c.bf16 %v43_v3, %v42_v2  ;;  %v190_v8 = vpack.c.bf16 %v45_v5, %v44_v4  ;;  %v46_v9 = vld [vmem:[#allocation2 + $0x20] sm:$0xff]  ;;  %v48_v12 = vld [vmem:[#allocation2 + $0x30] sm:$0xff]  ;;  %v29_v16 = vand.u32 127, %v28_v15  ;;  %s262_s0 = smov [#allocation5]  }
  0x16   :  { %v47_v10 = vld [vmem:[#allocation2 + $0x28] sm:$0xff]  ;;  %v49_v13 = vld [vmem:[#allocation2 + $0x38] sm:$0xff]  ;;  %s141_s1 = sshll.u32 %s262_s0, 4  ;;  %s142_s1 = int_to_ptr.vmem [resolvable:$true] %s141_s1 }
  0x17   :  { %187 = vmatprep.subr.bf16.mxu0 %v186_v7  ;;  %v194_v11 = vpack.c.bf16 %v47_v10, %v46_v9  ;;  %v198_v14 = vpack.c.bf16 %v49_v13, %v48_v12  ;;  %s231_s27 = scalar_lea.vmem %s142_s1, 256  ;;  %p236_p9 = scmp.lt.s32.totalorder %s142_s1, %s142_s1 }
  0x18   :  { %189 = vmatpush3.bf16.msra.mxu0 %v186_v7  ;;  %p232_p8 = scmp.ne.s32.totalorder %s142_s1, %s231_s27  ;;  %p237_p10 = scmp.lt.s32.totalorder %s231_s27, %s231_s27 }
  0x19   :  { %34 = vperm.xlu0 %208, %v27_v6   ;;  %191 = vmatprep.subr.bf16.mxu0 %v190_v8 }
  0x1a   :  { %p238_p11 = por %p237_p10, %p236_p9 }
  0x1c   :  { %193 = vmatpush3.bf16.msra.mxu0 %v190_v8  ;;  %p239_p12 = pnand %p238_p11, %p232_p8 }
  0x1d   :  { %195 = vmatprep.subr.bf16.mxu0 %v194_v11 }
  0x20   :  { %197 = vmatpush3.bf16.msra.mxu0 %v194_v11 }
  0x21   :  { %199 = vmatprep.subr.bf16.mxu0 %v198_v14 }
  0x24   :  { %201 = vmatpush3.bf16.msra.mxu0 %v198_v14 }
  0x94   :  { %v32_v17 = vpop.permute.xlu0 %31 }
  0x95   :  { %vm36_vm1 = vcmp.eq.s32.totalorder %v32_v17, %v29_v16 }
  0x96   :  { %v153_v19 = vsel %vm36_vm1, 1.0, %v261_v18 }
  0x97   :  { %183 = vmatprep.mubr.msk.f32.mxu0 %vm50_vm0, %v153_v19 }
  0x98   :  { %v35_v20 = vpop.permute.xlu0 %34 }
  0x99   :  { %vm37_vm2 = vcmp.eq.s32.totalorder %v35_v20, %v29_v16 }
  0x9a   :  { %v154_v21 = vsel %vm37_vm2, 1.0, %v261_v18 }
  0x9b   :  { %184 = vmatmul.mubr.msk.f32.vlgmr.msra.gmra.mrb[0].mxu0 %vm50_vm0, %v154_v21 }
 0x16e   :  { %v185_v22 = vpop.f32.mrb[0].mxu0 }
 0x16f   :  { %v133_v23 = vmul.f32 11.313708, %v185_v22  ;;  %v123_v24 = vpop.f32.mrb[1].mxu0 }
 0x170   :  { %v132_v25 = vmul.f32 11.313708, %v123_v24 }
 0x171   :  { %135 = vst [vmem:[#allocation5 + $0x8] sm:$0xff] %v133_v23 }
 0x172   :  { %134 = vst [vmem:[#allocation5] sm:$0xff] %v132_v25 }
 0x173   :  { %242 = shalt.err (!%p239_p12)
}
 0x174   :  { %s243_s30 = scalar_lea.hbm %s316_s2, 256 }
 0x175   :  { %p244_p13 = scmp.ne.s32.totalorder %s316_s2, %s243_s30  ;;  %p247_p0 = scmp.lt.u32.totalorder %s243_s30, %s316_s2 }
 0x177   :  { %p249_p1 = pnand %p247_p0, %p244_p13 }
 0x179   :  { %252 = shalt.err (!%p249_p1)
}
 0x17a   :  { %147 = dma.vmem_to_hbm [thread:$0]  %s142_s1, 256, %s316_s2, [#allocation4], %s258_s19, %s258_s19, %s259_s20  }
 0x17b   :  { %255 = dma.done.wait [#allocation4], 256  }
 0x17c   :  { %256 = vsyncadd [#allocation4], 4294967040 }
 0x17d   :  { %151 = vsyncpa [#allocation3], 1 }
 0x17e   :  { %152 = vsyncpa [#allocation4], 1 }

</bundles_post_ra>
